<compile_context>
chip_gen: v7x
topology: tpu7x:2x2x1
jax: 0.10.0
libtpu: 0.0.40
codegen_flags: <defaults>
</compile_context>

<pallas_src>
import functools

import jax
import jax.numpy as jnp
from jax import lax
from jax.experimental import pallas as pl
from jax.experimental.pallas import tpu as pltpu

LANE = 128
SUBLANE = 8


def _round_up(x, m):
    return ((x + m - 1) // m) * m


# ----------------------------- Pallas kernel ------------------------------ #
def classifier_kernel(patches_ref, wc_ref, bc_ref, wfc_ref, bfc_ref,
                      out_ref, acc_ref, *, hw, hw_pad):
    """Grid step (g, j, t): batch-group g, element j in group, spatial tile t.

    patches_ref: [tm, K]        bf16  im2col rows for batch (g*gb+j), tile t
    wc_ref:      [K, CFpad]     bf16  conv weight (flattened, transposed)
    bc_ref:      [1, CFpad]     f32   conv bias (zero-padded)
    wfc_ref:     [CFpad, NCpad] f32   classifier weight (transposed, padded)
    bfc_ref:     [1, NCpad]     f32   classifier bias (zero-padded)
    out_ref:     [gb, NCpad]    f32   logits, one sublane per batch element
    acc_ref:     [gb, CFpad]    f32   pooled-feature accumulator (scratch)
    """
    j = pl.program_id(1)
    t = pl.program_id(2)
    tm = patches_ref.shape[0]
    gb = acc_ref.shape[0]

    @pl.when(jnp.logical_and(j == 0, t == 0))
    def _init():
        acc_ref[...] = jnp.zeros_like(acc_ref)

    # 3x3 conv expressed as one MXU matmul over im2col rows (bf16 in, f32 acc).
    feat = jnp.dot(patches_ref[...], wc_ref[...],
                   preferred_element_type=jnp.float32)            # [tm, CFpad]
    feat = jnp.maximum(feat + bc_ref[...], 0.0)                   # bias+ReLU, f32 VPU
    feat = feat.astype(jnp.bfloat16)                              # bf16 MXU operand

    # Partial global-average-pool: one-hot row (sublane j) x feat on the MXU,
    # accumulated into f32 scratch.  Padded spatial rows are masked only when
    # they exist (static condition -> zero extra VPU work in the aligned case).
    sel = lax.broadcasted_iota(jnp.int32, (gb, tm), 0) == j
    if hw_pad != hw:
        col = lax.broadcasted_iota(jnp.int32, (gb, tm), 1) + t * tm
        sel = jnp.logical_and(sel, col < hw)
    poolw = jnp.where(sel, 1.0 / hw, 0.0).astype(jnp.bfloat16)    # [gb, tm]
    acc_ref[...] += jnp.dot(poolw, feat,
                            preferred_element_type=jnp.float32)   # [gb, CFpad]

    @pl.when(jnp.logical_and(j == pl.num_programs(1) - 1,
                             t == pl.num_programs(2) - 1))
    def _finalize():
        # Tiny classifier matmul kept in f32: no bf16 rounding of pooled mean.
        out_ref[...] = (jnp.dot(acc_ref[...], wfc_ref[...],
                                preferred_element_type=jnp.float32)
                        + bfc_ref[...])                           # [gb, NCpad]


# ------------------------------- JAX glue --------------------------------- #
def im2col_nchw(x, kh=3, kw=3, pad=1):
    """NCHW -> [B, H*W, Cin*kh*kw], stride 1, 'same' padding (PyTorch Conv2d)."""
    B, C, H, W = x.shape
    xp = jnp.pad(x, ((0, 0), (0, 0), (pad, pad), (pad, pad)))
    cols = []
    for ki in range(kh):
        for kj in range(kw):
            cols.append(xp[:, :, ki:ki + H, kj:kj + W])           # [B, C, H, W]
    patches = jnp.stack(cols, axis=2)                             # [B, C, kh*kw, H, W]
    patches = patches.transpose(0, 3, 4, 1, 2)                    # [B, H, W, C, kh*kw]
    return patches.reshape(B, H * W, C * kh * kw)


def multilabel_classifier_forward(x, params):
    """Forward pass identical in semantics to MultiLabelClassifier.forward."""
    B, Cin, H, W = x.shape
    num_classes, cf = params["w_fc"].shape
    _, _, kh, kw = params["w_conv"].shape
    K = Cin * kh * kw
    HW = H * W

    cfpad = _round_up(cf, LANE)
    ncpad = _round_up(num_classes, LANE)

    # Batch packing: gb batch elements share one (gb, NCpad) output block.
    gb = min(B, SUBLANE)
    n_g = pl.cdiv(B, gb)
    b_pad = n_g * gb

    # Spatial row tile: whole image when it fits; otherwise cap so the
    # double-buffered, lane-padded patch stream stays <= ~16 MiB of VMEM
    # (comfortable even on v7x's 64 MiB/TC; v5e/v6e have 128 MiB).
    patch_row_vmem = _round_up(K, LANE) * 2            # bf16 bytes/row in VMEM
    tm_cap = max(((16 << 20) // (2 * patch_row_vmem)) // SUBLANE * SUBLANE, 512)
    tm = min(_round_up(HW, SUBLANE), tm_cap)
    n_t = pl.cdiv(HW, tm)
    hw_pad = n_t * tm

    # --- XLA-side prep: im2col (K left UNPADDED in HBM), bf16 MXU operands ---
    # TODO(synk): for large images, do im2col inside the kernel (9 shifted-
    #             slice matmuls) to avoid wrapper-side read amplification.
    patches = im2col_nchw(x, kh, kw, pad=1)                       # [B, HW, K]
    patches = jnp.pad(patches, ((0, b_pad - B), (0, hw_pad - HW), (0, 0)))
    patches = patches.reshape(b_pad * hw_pad, K).astype(jnp.bfloat16)

    wc = params["w_conv"].reshape(cf, K).T                        # [K, CF]
    wc = jnp.pad(wc, ((0, 0), (0, cfpad - cf))).astype(jnp.bfloat16)
    bc = jnp.pad(params["b_conv"][None, :],
                 ((0, 0), (0, cfpad - cf))).astype(jnp.float32)
    wfc = jnp.pad(params["w_fc"].T,                               # [CF, NC] (f32!)
                  ((0, cfpad - cf), (0, ncpad - num_classes))).astype(jnp.float32)
    bfc = jnp.pad(params["b_fc"][None, :],
                  ((0, 0), (0, ncpad - num_classes))).astype(jnp.float32)

    flops = (2 * b_pad * hw_pad * K * cfpad            # conv matmul
             + 2 * b_pad * hw_pad * gb * cfpad         # pooling matmuls
             + 2 * n_g * gb * cfpad * ncpad)           # classifier matmul
    bytes_accessed = (patches.size * 2 + wc.size * 2
                      + (bc.size + wfc.size + bfc.size) * 4
                      + b_pad * ncpad * 4)

    # VMEM budget (lane-padded tiles, double-buffered streams, scratch).
    vmem_bytes = (2 * tm * _round_up(K, LANE) * 2                  # patches
                  + 2 * _round_up(K, SUBLANE) * cfpad * 2          # wc
                  + 2 * SUBLANE * cfpad * 4                        # bc
                  + 2 * cfpad * ncpad * 4                          # wfc
                  + 2 * SUBLANE * ncpad * 4                        # bfc
                  + 2 * SUBLANE * ncpad * 4                        # out block
                  + SUBLANE * cfpad * 4)                           # acc scratch
    vmem_limit = int(min(max(4 * vmem_bytes, 4 << 20), 32 << 20))

    kernel = functools.partial(classifier_kernel, hw=HW, hw_pad=hw_pad)

    out = pl.pallas_call(
        kernel,
        out_shape=jax.ShapeDtypeStruct((b_pad, ncpad), jnp.float32),
        grid_spec=pltpu.PrefetchScalarGridSpec(
            num_scalar_prefetch=0,
            grid=(n_g, gb, n_t),
            in_specs=[
                pl.BlockSpec((tm, K),
                             lambda g, j, t: ((g * gb + j) * n_t + t, 0)),
                pl.BlockSpec((K, cfpad), lambda g, j, t: (0, 0)),
                pl.BlockSpec((1, cfpad), lambda g, j, t: (0, 0)),
                pl.BlockSpec((cfpad, ncpad), lambda g, j, t: (0, 0)),
                pl.BlockSpec((1, ncpad), lambda g, j, t: (0, 0)),
            ],
            out_specs=pl.BlockSpec((gb, ncpad), lambda g, j, t: (g, 0)),
            scratch_shapes=[pltpu.VMEM((gb, cfpad), jnp.float32)],
        ),
        compiler_params=pltpu.CompilerParams(
            dimension_semantics=("parallel", "arbitrary", "arbitrary"),
            vmem_limit_bytes=vmem_limit,
        ),
        cost_estimate=pl.CostEstimate(
            flops=flops, transcendentals=0, bytes_accessed=bytes_accessed),
    )(patches, wc, bc, wfc, bfc)

    # Sublane b % gb of block b // gb holds the logits for batch element b.
    return out[:B, :num_classes]


def reference_forward(x, params):
    """Pure-JAX f32 reference of the same synthetic backbone."""
    cf, cin, kh, kw = params["w_conv"].shape
    patches = im2col_nchw(x, kh, kw, pad=1)                       # [B, HW, K]
    wc = params["w_conv"].reshape(cf, cin * kh * kw).T
    feat = jnp.maximum(patches @ wc + params["b_conv"][None, None, :], 0.0)
    pooled = feat.mean(axis=1)                                    # [B, CF]
    return pooled @ params["w_fc"].T + params["b_fc"][None, :]


def init_params(key, cin=4, cf=32, num_classes=14, kh=3, kw=3):
    k1, k2, k3, k4 = jax.random.split(key, 4)
    fan_conv = cin * kh * kw
    return {
        "w_conv": jax.random.normal(k1, (cf, cin, kh, kw), jnp.float32)
                  * (2.0 / fan_conv) ** 0.5,
        "b_conv": jax.random.normal(k2, (cf,), jnp.float32) * 0.01,
        "w_fc": jax.random.normal(k3, (num_classes, cf), jnp.float32)
                * (1.0 / cf) ** 0.5,
        "b_fc": jax.random.normal(k4, (num_classes,), jnp.float32) * 0.01,
    }


if __name__ == "__main__":
    key = jax.random.PRNGKey(0)
    kx, kp = jax.random.split(key)

    B, Cin, H, W = 2, 4, 16, 16
    num_classes = 14
    x = jax.random.normal(kx, (B, Cin, H, W), jnp.float32)        # NCHW, like PyTorch
    params = init_params(kp, cin=Cin, cf=32, num_classes=num_classes)

    fwd = jax.jit(multilabel_classifier_forward)
    logits = jax.block_until_ready(fwd(x, params))
    assert logits.shape == (B, num_classes)

    ref = jax.block_until_ready(reference_forward(x, params))
    max_err = float(jnp.max(jnp.abs(logits - ref)))
    assert max_err < 0.1, f"mismatch vs f32 reference: {max_err}"  # bf16 operand rounding

    print("KERNEL_OK")
</pallas_src>

<mosaic_0001>
module attributes {stable_mosaic.version = 11 : i64} {
  func.func @classifier_kernel(%arg0: i32, %arg1: i32, %arg2: i32, %arg3: memref<256x36xbf16, #tpu.memory_space<vmem>>, %arg4: memref<36x128xbf16, #tpu.memory_space<vmem>>, %arg5: memref<1x128xf32, #tpu.memory_space<vmem>>, %arg6: memref<128x128xf32, #tpu.memory_space<vmem>>, %arg7: memref<1x128xf32, #tpu.memory_space<vmem>>, %arg8: memref<2x128xf32, #tpu.memory_space<vmem>>, %arg9: memref<2x128xf32, #tpu.memory_space<vmem>>) attributes {dimension_semantics = [#tpu.dimension_semantics<parallel>, #tpu.dimension_semantics<arbitrary>, #tpu.dimension_semantics<arbitrary>], iteration_bounds = array<i64: 1, 2, 1>, scalar_prefetch = 0 : i64, scratch_operands = 1 : i64, tpu.core_type = #tpu.core_type<tc>, window_params = [{transform_indices = @transform_0, window_bounds = array<i64: 256, 36>}, {pipeline_mode = #tpu.pipeline_mode<synchronous>, transform_indices = @transform_1, window_bounds = array<i64: 36, 128>}, {pipeline_mode = #tpu.pipeline_mode<synchronous>, transform_indices = @transform_2, window_bounds = array<i64: 1, 128>}, {pipeline_mode = #tpu.pipeline_mode<synchronous>, transform_indices = @transform_3, window_bounds = array<i64: 128, 128>}, {pipeline_mode = #tpu.pipeline_mode<synchronous>, transform_indices = @transform_4, window_bounds = array<i64: 1, 128>}, {transform_indices = @transform_5, window_bounds = array<i64: 2, 128>}]} {
    %c0_i32 = arith.constant 0 : i32
    %0 = arith.cmpi eq, %arg1, %c0_i32 : i32
    %c0_i32_0 = arith.constant 0 : i32
    %1 = arith.cmpi eq, %arg2, %c0_i32_0 : i32
    %2 = arith.andi %0, %1 : i1
    %3 = arith.extui %2 : i1 to i32
    %c0_i32_1 = arith.constant 0 : i32
    %4 = arith.cmpi ne, %3, %c0_i32_1 : i32
    scf.if %4 {
      %cst_17 = arith.constant 0.000000e+00 : f32
      %30 = vector.broadcast %cst_17 : f32 to vector<2x128xf32>
      %c0_18 = arith.constant 0 : index
      %c0_19 = arith.constant 0 : index
      %31 = vector.load %arg9[%c0_18, %c0_19] : memref<2x128xf32, #tpu.memory_space<vmem>>, vector<2x128xf32>
      tpu.vector_store %arg9[%c0_18, %c0_19], %30 {strides = array<i32>} : memref<2x128xf32, #tpu.memory_space<vmem>>, vector<2x128xf32>,
    } else {
    }
    %c0 = arith.constant 0 : index
    %c0_2 = arith.constant 0 : index
    %5 = vector.load %arg3[%c0, %c0_2] : memref<256x36xbf16, #tpu.memory_space<vmem>>, vector<256x36xbf16>
    %c0_3 = arith.constant 0 : index
    %c0_4 = arith.constant 0 : index
    %6 = vector.load %arg4[%c0_3, %c0_4] : memref<36x128xbf16, #tpu.memory_space<vmem>>, vector<36x128xbf16>
    %cst = arith.constant dense<0.000000e+00> : vector<256x128xf32>
    %7 = tpu.matmul %5, %6, %cst {dimension_numbers = #tpu.dot_dimension_numbers<[1], [0], [0], [1], [0, 0, 1, 1], [], []>} : vector<256x36xbf16>, vector<36x128xbf16>, vector<256x128xf32> -> vector<256x128xf32>
    %c0_5 = arith.constant 0 : index
    %c0_6 = arith.constant 0 : index
    %8 = vector.load %arg5[%c0_5, %c0_6] : memref<1x128xf32, #tpu.memory_space<vmem>>, vector<1x128xf32>
    %9 = vector.broadcast %8 : vector<1x128xf32> to vector<256x128xf32>
    %10 = arith.addf %7, %9 : vector<256x128xf32>
    %cst_7 = arith.constant 0.000000e+00 : f32
    %11 = vector.broadcast %cst_7 : f32 to vector<256x128xf32>
    %12 = arith.maximumf %10, %11 : vector<256x128xf32>
    %13 = arith.truncf %12 : vector<256x128xf32> to vector<256x128xbf16>
    %14 = tpu.iota {dimensions = array<i32: 0>} : vector<2x256xi32>
    %15 = vector.broadcast %arg1 : i32 to vector<2x256xi32>
    %16 = arith.cmpi eq, %14, %15 : vector<2x256xi32>
    %cst_8 = arith.constant 3.906250e-03 : f32
    %cst_9 = arith.constant 0.000000e+00 : f32
    %17 = vector.broadcast %cst_8 : f32 to vector<2x256xf32>
    %18 = vector.broadcast %cst_9 : f32 to vector<2x256xf32>
    %19 = arith.select %16, %17, %18 : vector<2x256xi1>, vector<2x256xf32>
    %20 = arith.truncf %19 : vector<2x256xf32> to vector<2x256xbf16>
    %c0_10 = arith.constant 0 : index
    %c0_11 = arith.constant 0 : index
    %21 = vector.load %arg9[%c0_10, %c0_11] : memref<2x128xf32, #tpu.memory_space<vmem>>, vector<2x128xf32>
    %cst_12 = arith.constant dense<0.000000e+00> : vector<2x128xf32>
    %22 = tpu.matmul %20, %13, %cst_12 {dimension_numbers = #tpu.dot_dimension_numbers<[1], [0], [0], [1], [0, 0, 1, 1], [], []>} : vector<2x256xbf16>, vector<256x128xbf16>, vector<2x128xf32> -> vector<2x128xf32>
    %23 = arith.addf %21, %22 : vector<2x128xf32>
    %c0_13 = arith.constant 0 : index
    %c0_14 = arith.constant 0 : index
    %24 = vector.load %arg9[%c0_13, %c0_14] : memref<2x128xf32, #tpu.memory_space<vmem>>, vector<2x128xf32>
    tpu.vector_store %arg9[%c0_13, %c0_14], %23 {strides = array<i32>} : memref<2x128xf32, #tpu.memory_space<vmem>>, vector<2x128xf32>,
    %c1_i32 = arith.constant 1 : i32
    %25 = arith.cmpi eq, %arg1, %c1_i32 : i32
    %c0_i32_15 = arith.constant 0 : i32
    %26 = arith.cmpi eq, %arg2, %c0_i32_15 : i32
    %27 = arith.andi %25, %26 : i1
    %28 = arith.extui %27 : i1 to i32
    %c0_i32_16 = arith.constant 0 : i32
    %29 = arith.cmpi ne, %28, %c0_i32_16 : i32
    scf.if %29 {
      %c0_17 = arith.constant 0 : index
      %c0_18 = arith.constant 0 : index
      %30 = vector.load %arg9[%c0_17, %c0_18] : memref<2x128xf32, #tpu.memory_space<vmem>>, vector<2x128xf32>
      %c0_19 = arith.constant 0 : index
      %c0_20 = arith.constant 0 : index
      %31 = vector.load %arg6[%c0_19, %c0_20] : memref<128x128xf32, #tpu.memory_space<vmem>>, vector<128x128xf32>
      %cst_21 = arith.constant dense<0.000000e+00> : vector<2x128xf32>
      %32 = tpu.matmul %30, %31, %cst_21 {dimension_numbers = #tpu.dot_dimension_numbers<[1], [0], [0], [1], [0, 0, 1, 1], [], []>} : vector<2x128xf32>, vector<128x128xf32>, vector<2x128xf32> -> vector<2x128xf32>
      %c0_22 = arith.constant 0 : index
      %c0_23 = arith.constant 0 : index
      %33 = vector.load %arg7[%c0_22, %c0_23] : memref<1x128xf32, #tpu.memory_space<vmem>>, vector<1x128xf32>
      %34 = vector.broadcast %33 : vector<1x128xf32> to vector<2x128xf32>
      %35 = arith.addf %32, %34 : vector<2x128xf32>
      %c0_24 = arith.constant 0 : index
      %c0_25 = arith.constant 0 : index
      %36 = vector.load %arg8[%c0_24, %c0_25] : memref<2x128xf32, #tpu.memory_space<vmem>>, vector<2x128xf32>
      tpu.vector_store %arg8[%c0_24, %c0_25], %35 {strides = array<i32>} : memref<2x128xf32, #tpu.memory_space<vmem>>, vector<2x128xf32>,
    } else {
    }
    return
  }
  func.func @transform_0(%arg0: i32, %arg1: i32, %arg2: i32) -> (i32, i32) {
    %c2_i32 = arith.constant 2 : i32
    %0 = arith.muli %arg0, %c2_i32 : i32
    %1 = arith.addi %0, %arg1 : i32
    %c1_i32 = arith.constant 1 : i32
    %2 = arith.muli %1, %c1_i32 : i32
    %3 = arith.addi %2, %arg2 : i32
    %c0_i32 = arith.constant 0 : i32
    %c0_i32_0 = arith.constant 0 : i32
    return %3, %c0_i32 : i32, i32
  }
  func.func @transform_1(%arg0: i32, %arg1: i32, %arg2: i32) -> (i32, i32) {
    %c0_i32 = arith.constant 0 : i32
    %c0_i32_0 = arith.constant 0 : i32
    %c0_i32_1 = arith.constant 0 : i32
    return %c0_i32, %c0_i32_0 : i32, i32
  }
  func.func @transform_2(%arg0: i32, %arg1: i32, %arg2: i32) -> (i32, i32) {
    %c0_i32 = arith.constant 0 : i32
    %c0_i32_0 = arith.constant 0 : i32
    %c0_i32_1 = arith.constant 0 : i32
    return %c0_i32, %c0_i32_0 : i32, i32
  }
  func.func @transform_3(%arg0: i32, %arg1: i32, %arg2: i32) -> (i32, i32) {
    %c0_i32 = arith.constant 0 : i32
    %c0_i32_0 = arith.constant 0 : i32
    %c0_i32_1 = arith.constant 0 : i32
    return %c0_i32, %c0_i32_0 : i32, i32
  }
  func.func @transform_4(%arg0: i32, %arg1: i32, %arg2: i32) -> (i32, i32) {
    %c0_i32 = arith.constant 0 : i32
    %c0_i32_0 = arith.constant 0 : i32
    %c0_i32_1 = arith.constant 0 : i32
    return %c0_i32, %c0_i32_0 : i32, i32
  }
  func.func @transform_5(%arg0: i32, %arg1: i32, %arg2: i32) -> (i32, i32) {
    %c0_i32 = arith.constant 0 : i32
    %c0_i32_0 = arith.constant 0 : i32
    return %arg0, %c0_i32 : i32, i32
  }
}

</mosaic_0001>

<bundles_post_ra>
// kernel: multilabel_classifier_forward.1
= control target key start
LH: loop header
LB: loop body
LE: loop exit
PB: predicated region body
PF: predicated region fallthrough
CT: control target
= control target key end

     0   :  { %10 = vsyncpa [#allocation4], 0  ;;  %s1234_s18 = smov 0   ;;  %s1236_s19 = smov 0   ;;  %s1473_s0 = inlined_call_operand.vmem [shape: bf16[512,36], index: 0, kind: input, shape index: {}]   ;;  %s1474_s1 = inlined_call_operand.vmem [shape: bf16[36,128], index: 1, kind: input, shape index: {}]   ;;  %s1475_s2 = inlined_call_operand.vmem [shape: f32[1,128], index: 2, kind: input, shape index: {}]   ;;  %s1476_s3 = inlined_call_operand.vmem [shape: f32[128,128], index: 3, kind: input, shape index: {}]   ;;  %s1477_s4 = inlined_call_operand.vmem [shape: f32[1,128], index: 4, kind: input, shape index: {}]   ;;  %s1478_s5 = inlined_call_operand.hbm [shape: f32[2,128], index: 5, kind: output, shape index: {}]  }
   0x1   :  { %s1238_s20 = smov 0  }
   0x2 LB: > { %s878_s21 = sadd.s32 4294967295, %s1196_s20   ;;  %s31_s22 = sadd.s32 1, %s1192_s19  ;;  %s1196_s20 = sphi %s1238_s20, %s16_s20   ;;  %s1192_s19 = sphi %s1236_s19, %s1483_s19   ;;  %s1188_s18 = sphi %s1234_s18, %s1482_s18  }
   0x3   : > { %p33_p0 = scmp.ge.s32.totalorder %s31_s22, 2  ;;  %p881_p1 = scmp.ge.s32.totalorder %s1196_s20, 1 }
   0x4   : > { %p220_p2 = scmp.lt.s32.totalorder %s1196_s20, 3 }
   0x5   : > { %s1485_s22 = smov (%p33_p0, %s31_s22), 0 }
   0x6   : > { %p221_p3 = pnand %p881_p1, %p220_p2 }
   0x7   : > { %s882_s23 = sshll.u32 (!%p221_p3), %s1188_s18, 5  ;;  %p259_p4 = scmp.eq.s32.totalorder (!%p221_p3), %s1188_s18, 0 }
   0x8   : > { %224 = sbr.rel (%p221_p3) target bundleno = 785 (0x311), region = 40  ;;  %p250_p5 = scmp.lt.s32.totalorder (!%p221_p3), %s882_s23, 63 }
   0xf   : > { %s1487_s23 = smov (!%p250_p5, %s882_s23), 63  ;;  %264 = sbr.rel (!%p259_p4) target bundleno = 22 (0x16), region = 44 }
  0x10   : > { %s883_s24 = sshll.u32 %s1487_s23, 2  ;;  %v1198_v0 = vmov (%p259_p4), 0.0  }
  0x11   : > { %s1260_s27 = scalar_lea.vmem %s1473_s0, %s883_s24  ;;  %265 = vst [vmem:[#allocation2] sm:$0x3] (%p259_p4), %v1198_v0 }
  0x16 PF: > { %v1125_v1 = vld [vmem:[%s1474_s1] sm:$0xff]   ;;  %v1126_v2 = vld [vmem:[%s1474_s1 + $0x8] sm:$0xff]   ;;  %vm405_vm0 = vcmask 293888   ;;  %v1127_v3 = vld [vmem:[%s1474_s1 + $0x10] ss:$0 sps:$4 sm:$0x33]   ;;  %v667_v21 = vlaneseq  ;;  %v669_v23 = vstv %s1188_s18 }
  0x17   : > { %991 = vmatprep.subr.bf16.mxu0 %v1125_v1  ;;  %v1128_v4 = vld [vmem:[%s1260_s27] sm:$0xff]   ;;  %vm454_vm1 = vcmask 1041408   ;;  %v1129_v6 = vld [vmem:[%s1260_s27 + $0x8] sm:$0xff]   ;;  %v1130_v7 = vld [vmem:[%s1260_s27 + $0x10] sm:$0xff]   ;;  %v1199_v25 = vmov 0.00390625|0.00390625  }
  0x18   : > { %992 = vmatpush3.bf16.msra.mxu0 %v1125_v1  ;;  %997 = vmatprep.mubr.msk.bf16.mxu0 %vm405_vm0, %v1128_v4  ;;  %v456_v5 = vsel %vm454_vm1, %v1127_v3, 0  ;;  %v1131_v8 = vld [vmem:[%s1260_s27 + $0x18] sm:$0xff]   ;;  %v1132_v9 = vld [vmem:[%s1260_s27 + $0x20] sm:$0xff]   ;;  %v1133_v10 = vld [vmem:[%s1260_s27 + $0x28] sm:$0xff]   ;;  %v668_v22 = vshrl.u32 %v667_v21, 7  ;;  %p716_p6 = scmp.eq.s32.totalorder %s1188_s18, 1 }
  0x19   : > { %993 = vmatprep.subr.bf16.mxu0 %v1126_v2  ;;  %v1134_v11 = vld [vmem:[%s1260_s27 + $0x30] sm:$0xff]   ;;  %v1135_v12 = vld [vmem:[%s1260_s27 + $0x38] sm:$0xff]   ;;  %v1136_v13 = vld [vmem:[%s1260_s27 + $0x40] sm:$0xff]   ;;  %vm1201_vm4 = vmmov (%p716_p6), 0  }
  0x1a   : > { %v1137_v14 = vld [vmem:[%s1260_s27 + $0x48] sm:$0xff]   ;;  %v1138_v15 = vld [vmem:[%s1260_s27 + $0x50] sm:$0xff]   ;;  %v1139_v16 = vld [vmem:[%s1260_s27 + $0x58] sm:$0xff]   ;;  %vm1304_vm2 = vcmp.eq.s32.totalorder %v668_v22, %v669_v23 }
  0x1b   : > { %v1140_v17 = vld [vmem:[%s1260_s27 + $0x60] sm:$0xff]   ;;  %v1141_v18 = vld [vmem:[%s1260_s27 + $0x68] sm:$0xff]   ;;  %v1142_v19 = vld [vmem:[%s1260_s27 + $0x70] sm:$0xff]  }
  0x1c   : > { %994 = vmatpush3.bf16.msra.mxu0 %v1126_v2  ;;  %v1143_v20 = vld [vmem:[%s1260_s27 + $0x78] sm:$0xff]   ;;  %vm921_vm3 = vmpackc.low %vm1304_vm2, %vm1304_vm2  ;;  %v1320_v26 = vld [vmem:[%s1475_s2] ss:$0 sm:$0xff] }
  0x1d   : > { %1088 = vmatprep.subr.msk.bf16.mxu0 %vm454_vm1, %v1127_v3  ;;  %922 = vmatprep.mubr.msk.bf16.mxu1 %vm921_vm3, %v1199_v25  ;;  %v723_v24 = vld [vmem:[%s1476_s3 + $0x8] sm:$0xff] (%p716_p6) }
  0x20   : > { %996 = vmatpush3.bf16.msra.mxu0 %v456_v5 }
  0x23   : > { %998 = vmatmul.mubr.msk.bf16.vlgmr.msra.gmra.mrb[0].mxu0 %vm405_vm0, %v1129_v6 }
  0x24   : > { %1001 = vmatprep.mubr.msk.bf16.mxu0 %vm405_vm0, %v1130_v7 }
  0x2b   : > { %1002 = vmatmul.mubr.msk.bf16.gmra.mrb[4].mxu0 %vm405_vm0, %v1131_v8 }
  0x2c   : > { %1005 = vmatprep.mubr.msk.bf16.mxu0 %vm405_vm0, %v1132_v9 }
  0x33   : > { %1006 = vmatmul.mubr.msk.bf16.gmra.mrb[8].mxu0 %vm405_vm0, %v1133_v10 }
  0x34   : > { %1009 = vmatprep.mubr.msk.bf16.mxu0 %vm405_vm0, %v1134_v11 }
  0x3b   : > { %1010 = vmatmul.mubr.msk.bf16.gmra.mrb[12].mxu0 %vm405_vm0, %v1135_v12 }
  0x3c   : > { %1013 = vmatprep.mubr.msk.bf16.mxu0 %vm405_vm0, %v1136_v13 }
  0x43   : > { %1014 = vmatmul.mubr.msk.bf16.gmra.mrb[16].mxu0 %vm405_vm0, %v1137_v14 }
  0x44   : > { %1017 = vmatprep.mubr.msk.bf16.mxu0 %vm405_vm0, %v1138_v15 }
  0x4b   : > { %1018 = vmatmul.mubr.msk.bf16.gmra.mrb[20].mxu0 %vm405_vm0, %v1139_v16 }
  0x4c   : > { %1021 = vmatprep.mubr.msk.bf16.mxu0 %vm405_vm0, %v1140_v17 }
  0x53   : > { %1022 = vmatmul.mubr.msk.bf16.gmra.mrb[24].mxu0 %vm405_vm0, %v1141_v18 }
  0x54   : > { %1025 = vmatprep.mubr.msk.bf16.mxu0 %vm405_vm0, %v1142_v19 }
  0x5b   : > { %1026 = vmatmul.mubr.msk.bf16.gmra.mrb[28].mxu0 %vm405_vm0, %v1143_v20 }
  0xf6   : > { %v999_v27 = vpop.f32.mrb[0].mxu0 }
  0xf7   : > { %v501_v28 = vadd.f32 %v999_v27, %v1320_v26  ;;  %v492_v29 = vpop.f32.mrb[1].mxu0 }
  0xf8   : > { %v493_v30 = vadd.f32 %v1320_v26, %v492_v29  ;;  %v1000_v31 = vpop.f32.mrb[2].mxu0 }
  0xf9   : > { %v504_v32 = vadd.f32 %v1000_v31, %v1320_v26  ;;  %v495_v33 = vpop.f32.mrb[3].mxu0  ;;  %v621_v35 = vmax.f32 %v501_v28, 0.0 }
  0xfa   : > { %v496_v34 = vadd.f32 %v1320_v26, %v495_v33  ;;  %v619_v37 = vmax.f32 %v493_v30, 0.0 }
  0xfb   : > { %v622_v36 = vmax.f32 %v504_v32, 0.0 }
  0xfc   : > { %v620_v38 = vmax.f32 %v496_v34, 0.0 }
  0xfd   : > { %v1326_v39 = vpack.c.bf16 %v622_v36, %v621_v35 }
  0xfe   : > { %v1003_v40 = vpop.f32.mrb[4].mxu0  ;;  %v1328_v41 = vpack.c.bf16 %v620_v38, %v619_v37 }
  0xff   : > { %v517_v42 = vadd.f32 %v1003_v40, %v1320_v26  ;;  %v508_v43 = vpop.f32.mrb[5].mxu0 }
 0x100   : > { %v509_v44 = vadd.f32 %v1320_v26, %v508_v43  ;;  %v1004_v45 = vpop.f32.mrb[6].mxu0 }
 0x101   : > { %v520_v46 = vadd.f32 %v1004_v45, %v1320_v26  ;;  %v511_v47 = vpop.f32.mrb[7].mxu0  ;;  %v625_v49 = vmax.f32 %v517_v42, 0.0 }
 0x102   : > { %v512_v48 = vadd.f32 %v1320_v26, %v511_v47  ;;  %v623_v51 = vmax.f32 %v509_v44, 0.0 }
 0x103   : > { %v626_v50 = vmax.f32 %v520_v46, 0.0 }
 0x104   : > { %v624_v52 = vmax.f32 %v512_v48, 0.0 }
 0x105   : > { %v1334_v53 = vpack.c.bf16 %v626_v50, %v625_v49 }
 0x106   : > { %v1336_v54 = vpack.c.bf16 %v624_v52, %v623_v51  ;;  %v1007_v55 = vpop.f32.mrb[8].mxu0 }
 0x107   : > { %v533_v56 = vadd.f32 %v1007_v55, %v1320_v26  ;;  %v524_v57 = vpop.f32.mrb[9].mxu0 }
 0x108   : > { %v525_v58 = vadd.f32 %v1320_v26, %v524_v57  ;;  %v1008_v59 = vpop.f32.mrb[10].mxu0 }
 0x109   : > { %v536_v60 = vadd.f32 %v1008_v59, %v1320_v26  ;;  %v527_v61 = vpop.f32.mrb[11].mxu0  ;;  %v629_v63 = vmax.f32 %v533_v56, 0.0 }
 0x10a   : > { %v528_v62 = vadd.f32 %v1320_v26, %v527_v61  ;;  %v627_v1 = vmax.f32 %v525_v58, 0.0 }
 0x10b   : > { %v630_v0 = vmax.f32 %v536_v60, 0.0 }
 0x10c   : > { %v628_v2 = vmax.f32 %v528_v62, 0.0 }
 0x10d   : > { %v1342_v3 = vpack.c.bf16 %v630_v0, %v629_v63 }
 0x10e   : > { %v1344_v4 = vpack.c.bf16 %v628_v2, %v627_v1  ;;  %v1011_v5 = vpop.f32.mrb[12].mxu0 }
 0x10f   : > { %v549_v6 = vadd.f32 %v1011_v5, %v1320_v26  ;;  %v540_v7 = vpop.f32.mrb[13].mxu0 }
 0x110   : > { %v541_v8 = vadd.f32 %v1320_v26, %v540_v7  ;;  %v1012_v9 = vpop.f32.mrb[14].mxu0 }
 0x111   : > { %v552_v10 = vadd.f32 %v1012_v9, %v1320_v26  ;;  %v543_v11 = vpop.f32.mrb[15].mxu0  ;;  %v633_v13 = vmax.f32 %v549_v6, 0.0 }
 0x112   : > { %v544_v12 = vadd.f32 %v1320_v26, %v543_v11  ;;  %v631_v15 = vmax.f32 %v541_v8, 0.0 }
 0x113   : > { %v634_v14 = vmax.f32 %v552_v10, 0.0 }
 0x114   : > { %v632_v16 = vmax.f32 %v544_v12, 0.0 }
 0x115   : > { %v1350_v17 = vpack.c.bf16 %v634_v14, %v633_v13 }
 0x116   : > { %v1352_v18 = vpack.c.bf16 %v632_v16, %v631_v15  ;;  %v1015_v19 = vpop.f32.mrb[16].mxu0 }
 0x117   : > { %v565_v20 = vadd.f32 %v1015_v19, %v1320_v26  ;;  %v556_v21 = vpop.f32.mrb[17].mxu0 }
 0x118   : > { %v557_v22 = vadd.f32 %v1320_v26, %v556_v21  ;;  %v1016_v23 = vpop.f32.mrb[18].mxu0 }
 0x119   : > { %v568_v27 = vadd.f32 %v1016_v23, %v1320_v26  ;;  %v559_v28 = vpop.f32.mrb[19].mxu0  ;;  %v637_v30 = vmax.f32 %v565_v20, 0.0  ;;  %v725_v23 = vld [vmem:[%s1476_s3 + $0x18] sm:$0xff] (%p716_p6) }
 0x11a   : > { %v560_v29 = vadd.f32 %v1320_v26, %v559_v28  ;;  %v635_v32 = vmax.f32 %v557_v22, 0.0 }
 0x11b   : > { %v638_v31 = vmax.f32 %v568_v27, 0.0  ;;  %v1202_v27 = vmov (%p716_p6), 0.0  }
 0x11c   : > { %v636_v33 = vmax.f32 %v560_v29, 0.0  ;;  %1061 = vmatprep.mubr.msk.f32.mxu0 (%p716_p6), %vm1201_vm4, %v1202_v27  ;;  %v726_v29 = vld [vmem:[%s1476_s3 + $0x20] sm:$0xff] (%p716_p6) }
 0x11d   : > { %v660_v34 = vpack.c.bf16 %v638_v31, %v637_v30  ;;  %v727_v30 = vld [vmem:[%s1476_s3 + $0x28] sm:$0xff] (%p716_p6) }
 0x11e   : > { %v1019_v35 = vpop.f32.mrb[20].mxu0  ;;  %v659_v36 = vpack.c.bf16 %v636_v33, %v635_v32  ;;  %v1071_v31 = vpack.c.bf16 (%p716_p6), %v727_v30, %v726_v29  ;;  %v728_v32 = vld [vmem:[%s1476_s3 + $0x30] sm:$0xff] (%p716_p6)  ;;  %v729_v33 = vld [vmem:[%s1476_s3 + $0x38] sm:$0xff] (%p716_p6) }
 0x11f   : > { %v581_v37 = vadd.f32 %v1019_v35, %v1320_v26  ;;  %v572_v38 = vpop.f32.mrb[21].mxu0  ;;  %v730_v35 = vld [vmem:[%s1476_s3 + $0x40] sm:$0xff] (%p716_p6) }
 0x120   : > { %v573_v40 = vadd.f32 %v1320_v26, %v572_v38  ;;  %v1020_v42 = vpop.f32.mrb[22].mxu0  ;;  %952 = vmatprep.subr.bf16.mxu1 %v659_v36  ;;  %v731_v36 = vld [vmem:[%s1476_s3 + $0x48] sm:$0xff] (%p716_p6)  ;;  %v732_v38 = vld [vmem:[%s1476_s3 + $0x50] sm:$0xff] (%p716_p6) }
 0x121   : > { %v584_v43 = vadd.f32 %v1020_v42, %v1320_v26  ;;  %v575_v44 = vpop.f32.mrb[23].mxu0  ;;  %953 = vmatpush3.bf16.msra.mxu1 %v1328_v41  ;;  %v641_v46 = vmax.f32 %v581_v37, 0.0  ;;  %v1077_v37 = vpack.c.bf16 (%p716_p6), %v731_v36, %v730_v35 }
 0x122   : > { %v576_v45 = vadd.f32 %v1320_v26, %v575_v44  ;;  %954 = vmatprep.subr.bf16.mxu1 %v660_v34  ;;  %v639_v48 = vmax.f32 %v573_v40, 0.0  ;;  %v1074_v34 = vpack.c.bf16 (%p716_p6), %v729_v33, %v728_v32  ;;  %v733_v40 = vld [vmem:[%s1476_s3 + $0x58] sm:$0xff] (%p716_p6)  ;;  %v735_v44 = vld [vmem:[%s1476_s3 + $0x68] sm:$0xff] (%p716_p6) }
 0x123   : > { %v642_v47 = vmax.f32 %v584_v43, 0.0  ;;  %v1080_v42 = vpack.c.bf16 (%p716_p6), %v733_v40, %v732_v38  ;;  %v734_v43 = vld [vmem:[%s1476_s3 + $0x60] sm:$0xff] (%p716_p6) }
 0x124   : > { %v640_v49 = vmax.f32 %v576_v45, 0.0  ;;  %v1083_v45 = vpack.c.bf16 (%p716_p6), %v735_v44, %v734_v43 }
 0x125   : > { %v662_v50 = vpack.c.bf16 %v642_v47, %v641_v46  ;;  %955 = vmatpush3.bf16.msra.mxu1 %v1326_v39  ;;  %v736_v46 = vld [vmem:[%s1476_s3 + $0x70] sm:$0xff] (%p716_p6)  ;;  %v737_v47 = vld [vmem:[%s1476_s3 + $0x78] sm:$0xff] (%p716_p6) }
 0x126   : > { %v661_v51 = vpack.c.bf16 %v640_v49, %v639_v48  ;;  %v1023_v52 = vpop.f32.mrb[24].mxu0  ;;  %v1086_v48 = vpack.c.bf16 (%p716_p6), %v737_v47, %v736_v46 }
 0x127   : > { %v597_v55 = vadd.f32 %v1023_v52, %v1320_v26  ;;  %v588_v56 = vpop.f32.mrb[25].mxu0 }
 0x128   : > { %v589_v57 = vadd.f32 %v1320_v26, %v588_v56  ;;  %v1024_v58 = vpop.f32.mrb[26].mxu0  ;;  %956 = vmatprep.subr.bf16.mxu1 %v661_v51 }
 0x129   : > { %v600_v41 = vadd.f32 %v1024_v58, %v1320_v26  ;;  %v591_v59 = vpop.f32.mrb[27].mxu0  ;;  %957 = vmatpush3.bf16.msra.mxu1 %v1336_v54  ;;  %v645_v61 = vmax.f32 %v597_v55, 0.0 }
 0x12a   : > { %v592_v60 = vadd.f32 %v1320_v26, %v591_v59  ;;  %958 = vmatprep.subr.bf16.mxu1 %v662_v50  ;;  %v643_v39 = vmax.f32 %v589_v57, 0.0  ;;  %v926_v50 = vld [vmem:[%s1477_s4] ss:$0 sm:$0xff] (%p716_p6) }
 0x12b   : > { %v646_v62 = vmax.f32 %v600_v41, 0.0 }
 0x12c   : > { %v644_v63 = vmax.f32 %v592_v60, 0.0 }
 0x12d   : > { %v664_v0 = vpack.c.bf16 %v646_v62, %v645_v61  ;;  %959 = vmatpush3.bf16.msra.mxu1 %v1334_v53 }
 0x12e   : > { %v663_v1 = vpack.c.bf16 %v644_v63, %v643_v39  ;;  %v1027_v2 = vpop.f32.mrb[28].mxu0 }
 0x12f   : > { %v613_v5 = vadd.f32 %v1027_v2, %v1320_v26  ;;  %v604_v6 = vpop.f32.mrb[29].mxu0 }
 0x130   : > { %v605_v7 = vadd.f32 %v1320_v26, %v604_v6  ;;  %v1028_v8 = vpop.f32.mrb[30].mxu0  ;;  %960 = vmatprep.subr.bf16.mxu1 %v663_v1 }
 0x131   : > { %v616_v54 = vadd.f32 %v1028_v8, %v1320_v26  ;;  %v607_v9 = vpop.f32.mrb[31].mxu0  ;;  %961 = vmatpush3.bf16.msra.mxu1 %v1344_v4  ;;  %v649_v11 = vmax.f32 %v613_v5, 0.0  ;;  %v673_v4 = vld [vmem:[#allocation2] sm:$0x3] }
 0x132   : > { %v608_v10 = vadd.f32 %v1320_v26, %v607_v9  ;;  %962 = vmatprep.subr.bf16.mxu1 %v664_v0  ;;  %v647_v12 = vmax.f32 %v605_v7, 0.0 }
 0x133   : > { %v650_v53 = vmax.f32 %v616_v54, 0.0 }
 0x134   : > { %v648_v13 = vmax.f32 %v608_v10, 0.0 }
 0x135   : > { %v666_v14 = vpack.c.bf16 %v650_v53, %v649_v11  ;;  %963 = vmatpush3.bf16.msra.mxu1 %v1342_v3 }
 0x136   : > { %v665_v15 = vpack.c.bf16 %v648_v13, %v647_v12 }
 0x138   : > { %964 = vmatprep.subr.bf16.mxu1 %v665_v15 }
 0x139   : > { %965 = vmatpush3.bf16.msra.mxu1 %v1352_v18  ;;  %v1200_v18 = vmov (%p716_p6), 0.0|0.0  }
 0x13a   : > { %966 = vmatprep.subr.bf16.mxu1 %v666_v14  ;;  %1064 = vmatprep.subr.bf16.mxu0 (%p716_p6), %v1200_v18 }
 0x13d   : > { %967 = vmatpush3.bf16.msra.mxu1 %v1350_v17  ;;  %v722_v17 = vld [vmem:[%s1476_s3] sm:$0xff] (%p716_p6) }
 0x13e   : > { %v1065_v22 = vpack.c.bf16 (%p716_p6), %v723_v24, %v722_v17 }
 0x140   : > { %924 = vmatmul.mubr.msk.bf16.vlgmr.msra.gmra.mrb[0].mxu1 %vm921_vm3, %v1199_v25  ;;  %v724_v25 = vld [vmem:[%s1476_s3 + $0x10] sm:$0xff] (%p716_p6)  ;;  %1066 = vmatpush3.bf16.msra.mxu0 (%p716_p6), %v1065_v22 }
 0x141   : > { %v1068_v28 = vpack.c.bf16 (%p716_p6), %v725_v23, %v724_v25  ;;  %1067 = vmatprep.subr.bf16.mxu0 (%p716_p6), %v1200_v18 }
 0x144   : > { %1069 = vmatpush3.bf16.msra.mxu0 (%p716_p6), %v1068_v28 }
 0x145   : > { %1070 = vmatprep.subr.bf16.mxu0 (%p716_p6), %v1200_v18 }
 0x148   : > { %1072 = vmatpush3.bf16.msra.mxu0 (%p716_p6), %v1071_v31 }
 0x149   : > { %1073 = vmatprep.subr.bf16.mxu0 (%p716_p6), %v1200_v18 }
 0x14c   : > { %1075 = vmatpush3.bf16.msra.mxu0 (%p716_p6), %v1074_v34 }
 0x14d   : > { %1076 = vmatprep.subr.bf16.mxu0 (%p716_p6), %v1200_v18 }
 0x150   : > { %1078 = vmatpush3.bf16.msra.mxu0 (%p716_p6), %v1077_v37 }
 0x151   : > { %1079 = vmatprep.subr.bf16.mxu0 (%p716_p6), %v1200_v18 }
 0x154   : > { %1081 = vmatpush3.bf16.msra.mxu0 (%p716_p6), %v1080_v42 }
 0x155   : > { %1082 = vmatprep.subr.bf16.mxu0 (%p716_p6), %v1200_v18 }
 0x158   : > { %1084 = vmatpush3.bf16.msra.mxu0 (%p716_p6), %v1083_v45 }
 0x159   : > { %1085 = vmatprep.subr.bf16.mxu0 (%p716_p6), %v1200_v18 }
 0x15c   : > { %1087 = vmatpush3.bf16.msra.mxu0 (%p716_p6), %v1086_v48 }
 0x213   : > { %v968_v26 = vpop.f32.mrb[0].mxu1  ;;  %720 = sbr.rel (!%p716_p6) target bundleno = 760 (0x2f8), region = 48 }
 0x214   : > { %v969_v16 = vpop.f32.mrb[1].mxu1 }
 0x215   : > { %v970_v19 = vadd.f32 %v969_v16, %v968_v26  ;;  %v971_v3 = vpop.f32.mrb[2].mxu1 }
 0x216   : > { %v972_v20 = vpop.f32.mrb[3].mxu1 }
 0x217   : > { %v714_v21 = vadd.f32 %v970_v19, %v673_v4 }
 0x219   : > { %715 = vst [vmem:[#allocation2] sm:$0x3] %v714_v21 }
 0x220   : > { %v721_v49 = vld [vmem:[#allocation2] sm:$0x3] }
 0x221   : > { %1062 = vmatmul.mubr.f32.vlgmr.msra.gmra.mrb[0].mxu0 %v721_v49 }
 0x2f4   : > { %v811_v51 = vpop.f32.mrb[0].mxu0 }
 0x2f5   : > { %v812_v52 = vadd.f32 %v926_v50, %v811_v51  ;;  %v1063_v55 = vpop.f32.mrb[1].mxu0 }
 0x2f7   : > { %815 = vst [vmem:[#allocation3] sm:$0x3] %v812_v52 }
 0x2f8 PF: > { %p1438_p7 = scmp.eq.s32.totalorder %s878_s21, 1  ;;  %s1203_s29 = smov [#allocation3]  }
 0x2f9   : > { %s825_s30 = sshll.u32 %s1203_s29, 4  ;;  %s826_s30 = int_to_ptr.vmem [resolvable:$true] %s825_s30 }
 0x2fa   : > { %s1144_s6 = scalar_lea.vmem %s826_s30, 32  ;;  %p1151_p11 = scmp.lt.s32.totalorder %s826_s30, %s826_s30 }
 0x2fb   : > { %p1145_p8 = scmp.ne.s32.totalorder %s826_s30, %s1144_s6  ;;  %p1152_p12 = scmp.lt.s32.totalorder %s1144_s6, %s1144_s6 }
 0x2fd   : > { %p1146_p9 = pnand %p1145_p8, %p1438_p7  ;;  %p1153_p13 = por %p1152_p12, %p1151_p11 }
 0x2ff   : > { %p1147_p10 = pneg %p1146_p9 }
 0x301   : > { %p1154_p0 = pnand %p1153_p13, %p1147_p10 }
 0x303   : > { %1157 = shalt.err (!%p1154_p0)
}
 0x304   : > { %s1158_s21 = scalar_lea.hbm %s1478_s5, 32 }
 0x305   : > { %p1159_p1 = scmp.ne.s32.totalorder %s1478_s5, %s1158_s21  ;;  %p1164_p4 = scmp.lt.u32.totalorder %s1158_s21, %s1478_s5 }
 0x307   : > { %p1160_p2 = pnand %p1159_p1, %p1438_p7 }
 0x309   : > { %p1161_p3 = pneg %p1160_p2 }
 0x30b   : > { %p1166_p5 = pnand %p1164_p4, %p1161_p3 }
 0x30d   : > { %1169 = shalt.err (!%p1166_p5)
}
 0x30e   : > { %1090 = dma.vmem_to_hbm [thread:$0]  (%p1438_p7), %s826_s30, 32, %s1478_s5, [#allocation4]  }
 0x30f   : > { %1183 = dma.done.wait (%p1438_p7), [#allocation4], 32  }
 0x310   : > { %1185 = vsyncadd (%p1438_p7), [#allocation4], 4294967264 }
 0x311 PF: > { %s16_s20 = sadd.s32 1, %s1196_s20   ;;  %s1482_s18 = smov %s1192_s19 }
 0x312   : > { %p13_p6 = scmp.ge.s32.totalorder %s16_s20, 4   ;;  %s1483_s19 = smov %s1485_s22 }
 0x314   :  { %15 = sbr.rel (!%p13_p6) target bundleno = 2 (0x2), region = 76 }
 0x31b   :  { %838 = vsyncpa [#allocation4], 1 }
 0x31c   :  { %840 = vsyncpa [#allocation4 + $0x1], 1 }

</bundles_post_ra>
